<compile_context>
chip_gen: v5e
topology: v5e:2x2
jax: 0.10.0
libtpu: 0.0.40
codegen_flags: <defaults>
</compile_context>

<pallas_src>
import jax
import jax.numpy as jnp
from jax.experimental import pallas as pl
from jax.experimental.pallas import tpu as pltpu

IN_FEATURES = 3
OUT_FEATURES = 16
GROUPS = 8                          # batch rows packed per lane-dense row
PACKED_IN = IN_FEATURES * GROUPS    # 24
PACKED_OUT = OUT_FEATURES * GROUPS  # 128  (full lane width)
BIAS_ROW = PACKED_IN                # row 24 of the folded constant
WB_ROWS = 32                        # 24 weight rows + 1 bias row, padded to 8k


def pack_params(weight, bias):
    """One-time preprocessing of nn.Linear(3,16) params into a single
    lane-dense (32, 128) constant: block-diagonal weight + tiled bias row."""
    w_t = jnp.asarray(weight, jnp.float32).T            # (3, 16)
    b = jnp.asarray(bias, jnp.float32)                  # (16,)
    wb = jnp.zeros((WB_ROWS, PACKED_OUT), jnp.float32)
    for g in range(GROUPS):
        wb = wb.at[g * IN_FEATURES:(g + 1) * IN_FEATURES,
                   g * OUT_FEATURES:(g + 1) * OUT_FEATURES].set(w_t)
    wb = wb.at[BIAS_ROW, :].set(jnp.tile(b, GROUPS))
    return wb


def _linear_kernel(x_ref, wb_ref, o_ref):
    # x_ref: (tbp, 24)   wb_ref: (32, 128)   o_ref: (tbp, 128)
    x = x_ref[...]
    w = wb_ref[0:PACKED_IN, :]                # (24, 128) block-diag weight
    b = wb_ref[BIAS_ROW:BIAS_ROW + 1, :]      # (1, 128)  tiled bias
    y = jnp.dot(x, w, preferred_element_type=jnp.float32) + b
    o_ref[...] = y.astype(o_ref.dtype)


def _foonet_forward_pallas(x, wb, *, block_b=32768):
    """Lane-dense Pallas path.  x: (B, 3) f32, wb: (32, 128) f32 -> (B, 16)."""
    B = x.shape[0]
    b_pad = ((B + GROUPS - 1) // GROUPS) * GROUPS
    if b_pad != B:
        x = jnp.concatenate(
            [x, jnp.zeros((b_pad - B, IN_FEATURES), x.dtype)], axis=0)
    bp = b_pad // GROUPS
    xp = x.reshape(bp, PACKED_IN)             # free row-major reshape

    # Packed-row tile: large (HBM-streaming kernel), multiple of 8 sublanes
    # (or the full extent), and split into >= 2 grid steps when there is
    # enough work so v7x's two TensorCores both participate.
    tbp = min(max(block_b // GROUPS, 8), bp)
    if tbp < bp:
        tbp = max(8, (tbp // 8) * 8)          # round DOWN to sublane multiple
    elif bp >= 16:
        tbp = (((bp + 1) // 2) + 7) // 8 * 8  # ~half the batch, 8-aligned
    grid = (pl.cdiv(bp, tbp),)

    yp = pl.pallas_call(
        _linear_kernel,
        out_shape=jax.ShapeDtypeStruct((bp, PACKED_OUT), x.dtype),
        grid=grid,
        in_specs=[
            pl.BlockSpec((tbp, PACKED_IN), lambda i: (i, 0)),
            pl.BlockSpec((WB_ROWS, PACKED_OUT), lambda i: (0, 0)),
        ],
        out_specs=pl.BlockSpec((tbp, PACKED_OUT), lambda i: (i, 0)),
        compiler_params=pltpu.CompilerParams(
            dimension_semantics=("parallel",),
        ),
        cost_estimate=pl.CostEstimate(
            flops=2 * b_pad * IN_FEATURES * OUT_FEATURES,
            transcendentals=0,
            bytes_accessed=b_pad * (IN_FEATURES + OUT_FEATURES) * 4
            + WB_ROWS * PACKED_OUT * 4,
        ),
    )(xp, wb)

    y = yp.reshape(b_pad, OUT_FEATURES)       # free reshape back to (B, 16)
    return y[:B] if b_pad != B else y


def foonet_forward(x, wb, *, block_b=32768, min_pallas_batch=4096):
    """FooNet.forward: y = x @ W^T + b  (nn.Linear(3, 16)).

    x:  (B, 3)    float32
    wb: (32, 128) float32 -- packed params from pack_params(weight, bias)
    returns (B, 16) float32
    """
    if x.shape[0] < min_pallas_batch:
        # Tiny batch: kernel-launch + HBM round trip dominates; let XLA fuse.
        w_t = wb[:IN_FEATURES, :OUT_FEATURES]
        b = wb[BIAS_ROW, :OUT_FEATURES]
        return x @ w_t + b
    return _foonet_forward_pallas(x, wb, block_b=block_b)


if __name__ == "__main__":
    key = jax.random.PRNGKey(0)
    kx, kw, kb = jax.random.split(key, 3)

    # Deterministic parameter init (mimics PyTorch's U(-1/sqrt(in), 1/sqrt(in))).
    bound = 1.0 / jnp.sqrt(jnp.float32(IN_FEATURES))
    weight = jax.random.uniform(
        kw, (OUT_FEATURES, IN_FEATURES), jnp.float32, -bound, bound)
    bias = jax.random.uniform(kb, (OUT_FEATURES,), jnp.float32, -bound, bound)

    # Round test data to bf16-representable f32 values so the reference check
    # is tight regardless of how many MXU passes the f32 matmul uses.
    weight = weight.astype(jnp.bfloat16).astype(jnp.float32)
    bias = bias.astype(jnp.bfloat16).astype(jnp.float32)

    # One-time parameter preprocessing (outside the per-call path).
    wb = pack_params(weight, bias)            # (32, 128)
    w_t = weight.T                            # (3, 16) for the exact reference

    ok = True
    # B=8: single packed row; B=37: needs zero-padding; B=128: 2 grid steps.
    for B in (8, 37, 128):
        x = jax.random.normal(jax.random.fold_in(kx, B), (B, IN_FEATURES),
                              jnp.float32)
        x = x.astype(jnp.bfloat16).astype(jnp.float32)

        # Force the Pallas path even at these small test shapes.
        y = jax.block_until_ready(foonet_forward(x, wb, min_pallas_batch=0))

        # Exact elementwise f32 reference (no MXU rounding).
        y_ref = (x[:, :, None] * w_t[None, :, :]).sum(axis=1) + bias
        ok &= y.shape == (B, OUT_FEATURES)
        ok &= bool(jnp.allclose(y, y_ref, atol=1e-5, rtol=1e-5))

        # Also sanity-check the small-batch jnp fallback path.
        y_fb = jax.block_until_ready(foonet_forward(x, wb))
        ok &= bool(jnp.allclose(y_fb, y_ref, atol=1e-4, rtol=1e-4))

    assert ok
    print("KERNEL_OK")
</pallas_src>

<mosaic_0001>
module attributes {stable_mosaic.version = 11 : i64} {
  func.func @_linear_kernel(%arg0: i32, %arg1: memref<1x24xf32, #tpu.memory_space<vmem>>, %arg2: memref<32x128xf32, #tpu.memory_space<vmem>>, %arg3: memref<1x128xf32, #tpu.memory_space<vmem>>) attributes {dimension_semantics = [#tpu.dimension_semantics<parallel>], iteration_bounds = array<i64: 1>, scalar_prefetch = 0 : i64, scratch_operands = 0 : i64, tpu.core_type = #tpu.core_type<tc>, window_params = [{transform_indices = @transform_0, window_bounds = array<i64: 1, 24>}, {pipeline_mode = #tpu.pipeline_mode<synchronous>, transform_indices = @transform_1, window_bounds = array<i64: 32, 128>}, {transform_indices = @transform_2, window_bounds = array<i64: 1, 128>}]} {
    %c0 = arith.constant 0 : index
    %c0_0 = arith.constant 0 : index
    %0 = vector.load %arg1[%c0, %c0_0] : memref<1x24xf32, #tpu.memory_space<vmem>>, vector<1x24xf32>
    %c0_1 = arith.constant 0 : index
    %c0_2 = arith.constant 0 : index
    %1 = vector.load %arg2[%c0_1, %c0_2] : memref<32x128xf32, #tpu.memory_space<vmem>>, vector<24x128xf32>
    %c24 = arith.constant 24 : index
    %c0_3 = arith.constant 0 : index
    %2 = vector.load %arg2[%c24, %c0_3] : memref<32x128xf32, #tpu.memory_space<vmem>>, vector<1x128xf32>
    %cst = arith.constant dense<0.000000e+00> : vector<1x128xf32>
    %3 = tpu.matmul %0, %1, %cst {dimension_numbers = #tpu.dot_dimension_numbers<[1], [0], [0], [1], [0, 0, 1, 1], [], []>} : vector<1x24xf32>, vector<24x128xf32>, vector<1x128xf32> -> vector<1x128xf32>
    %4 = arith.addf %3, %2 : vector<1x128xf32>
    %c0_4 = arith.constant 0 : index
    %c0_5 = arith.constant 0 : index
    %5 = vector.load %arg3[%c0_4, %c0_5] : memref<1x128xf32, #tpu.memory_space<vmem>>, vector<1x128xf32>
    tpu.vector_store %arg3[%c0_4, %c0_5], %4 {strides = array<i32>} : memref<1x128xf32, #tpu.memory_space<vmem>>, vector<1x128xf32>,
    return
  }
  func.func @transform_0(%arg0: i32) -> (i32, i32) {
    %c0_i32 = arith.constant 0 : i32
    %c0_i32_0 = arith.constant 0 : i32
    return %arg0, %c0_i32 : i32, i32
  }
  func.func @transform_1(%arg0: i32) -> (i32, i32) {
    %c0_i32 = arith.constant 0 : i32
    %c0_i32_0 = arith.constant 0 : i32
    %c0_i32_1 = arith.constant 0 : i32
    return %c0_i32, %c0_i32_0 : i32, i32
  }
  func.func @transform_2(%arg0: i32) -> (i32, i32) {
    %c0_i32 = arith.constant 0 : i32
    %c0_i32_0 = arith.constant 0 : i32
    return %arg0, %c0_i32 : i32, i32
  }
}

</mosaic_0001>

<bundles_post_ra>
// kernel: tpu_custom_call.1
= control target key start
LH: loop header
LB: loop body
LE: loop exit
PB: predicated region body
PF: predicated region fallthrough
CT: control target
= control target key end

     0   :  { %7 = vsyncpa [#allocation3], 0  ;;  %s203_s0 = inlined_call_operand.hbm [shape: f32[1,24], index: 0, kind: input, shape index: {}]   ;;  %s204_s1 = inlined_call_operand.hbm [shape: f32[32,128], index: 1, kind: input, shape index: {}]   ;;  %s205_s2 = inlined_call_operand.hbm [shape: f32[1,128], index: 2, kind: output, shape index: {}]  }
   0x1   :  { %8 = vsyncpa [#allocation6], 0 }
   0x2   :  { %9 = vsyncpa [#allocation4], 0  ;;  %s15_s11 = sshll.u32 %s203_s0, 4  ;;  %s174_s12 = smov [#allocation2]   ;;  %s16_s11 = int_to_ptr.hbm [resolvable:$true] %s15_s11 }
   0x3   :  { %s17_s13 = sshll.u32 %s174_s12, 4  ;;  %s25_s16 = sshll.u32 %s204_s1, 4  ;;  %s18_s13 = int_to_ptr.vmem [resolvable:$true] %s17_s13  ;;  %s26_s16 = int_to_ptr.hbm [resolvable:$true] %s25_s16 }
   0x4   :  { %20 = dma.hbm_to_vmem [thread:$0]  %s16_s11, 16, %s18_s13, [#allocation3]  }
   0x5   :  { %s175_s17 = smov [#allocation5]   ;;  %s176_s19 = smov 128  }
   0x6   :  { %s27_s18 = sshll.u32 %s175_s17, 4  ;;  %s177_s20 = smov 8   ;;  %s28_s18 = int_to_ptr.vmem [resolvable:$true] %s27_s18 }
   0x7   :  { %33 = dma.hbm_to_vmem [thread:$0]  %s26_s16, 512, %s28_s18, [#allocation6], %s176_s19, %s176_s19, %s177_s20  }
   0x8   :  { %168 = dma.done.wait [#allocation3], 16  }
   0x9   :  { %169 = vsyncadd [#allocation3], 4294967280 }
   0xa   :  { %170 = dma.done.wait [#allocation6], 512  }
   0xb   :  { %171 = vsyncadd [#allocation6], 4294966784  ;;  %v45_v0 = vld [vmem:[#allocation5 + $0x10] sm:$0xff]  ;;  %v44_v1 = vld [vmem:[#allocation5 + $0x8] sm:$0xff]  ;;  %vm47_vm0 = vcmask 195584   ;;  %s178_s0 = smov [#allocation7]  }
   0xc   :  { %64 = vmatpush.msra.mxu0 %v45_v0  ;;  %v43_v2 = vld [vmem:[#allocation5] sm:$0xff]  ;;  %v42_v3 = vld [vmem:[#allocation2] sm:$0x1]  ;;  %v46_v4 = vld [vmem:[#allocation5 + $0x18] sm:$0x1]  ;;  %s77_s1 = sshll.u32 %s178_s0, 4  ;;  %s78_s1 = int_to_ptr.vmem [resolvable:$true] %s77_s1 }
   0xd   :  { %s79_s23 = sshll.u32 %s205_s2, 4  ;;  %s80_s23 = int_to_ptr.hbm [resolvable:$true] %s79_s23 }
   0xe   :  { %65 = vmatpush.msra.mxu0 %v44_v1 }
  0x10   :  { %66 = vmatpush.msra.mxu0 %v43_v2 }
  0x11   :  { %90 = vmatmul.msk.f32.vlgmr.msra.gmra.mxu0 %vm47_vm0, %v42_v3 }
  0x8e   :  { %v68_v5 = vpop.f32.mrf.mxu0 }
  0x8f   :  { %v69_v6 = vadd.f32 %v68_v5, %v46_v4 }
  0x91   :  { %71 = vst [vmem:[#allocation7] sm:$0x1] %v69_v6 }
  0x92   :  { %82 = dma.vmem_to_hbm [thread:$0]  %s78_s1, 16, %s80_s23, [#allocation4]  }
  0x93   :  { %172 = dma.done.wait [#allocation4], 16  }
  0x94   :  { %173 = vsyncadd [#allocation4], 4294967280 }
  0x95   :  { %87 = vsyncpa [#allocation3], 1 }
  0x96   :  { %88 = vsyncpa [#allocation6], 1 }
  0x97   :  { %89 = vsyncpa [#allocation4], 1 }

</bundles_post_ra>
